<compile_context>
chip_gen: v7x
topology: tpu7x:2x2x1
jax: 0.10.0
libtpu: 0.0.40
codegen_flags: <defaults>
</compile_context>

<pallas_src>
import functools

import jax
import jax.numpy as jnp
from jax.experimental import pallas as pl
from jax.experimental.pallas import tpu as pltpu


def _masked_rmse_kernel(s_ref, t_ref, m_ref, num_out_ref, den_out_ref,
                        sel_ref, num_acc_ref, den_acc_ref,
                        *, rows, valid_rows, channels, needs_mask):
    i = pl.program_id(1)

    @pl.when(i == 0)
    def _init():
        # Ones-selector for the per-point channel sum on the MXU:
        #   sel[k, lane] = 1.0  iff  k // C == lane
        # (formulated with mul/cmp only — no integer division on the VPU).
        k = jax.lax.broadcasted_iota(jnp.int32, (128 * channels, 128), 0)
        lane = jax.lax.broadcasted_iota(jnp.int32, (128 * channels, 128), 1)
        lo = lane * channels
        sel_ref[...] = ((k >= lo) & (k < lo + channels)).astype(jnp.float32)
        num_acc_ref[...] = jnp.zeros_like(num_acc_ref)
        den_acc_ref[...] = jnp.zeros_like(den_acc_ref)

    # Lane-dense squared differences; math in f32 (inputs may be bf16).
    diff = s_ref[...].astype(jnp.float32) - t_ref[...].astype(jnp.float32)
    sqd = diff * diff
    # sq_sum[r, l] = sum_c sqd[r, l*C + c]   — MXU work, hidden under the DMA.
    sq_sum = jnp.dot(sqd, sel_ref[...], preferred_element_type=jnp.float32)
    m = m_ref[...].astype(jnp.float32)                          # (rows, 128)

    def _accumulate(sq, mm):
        per_point = jnp.sqrt(sq)                                # EUP
        num_acc_ref[...] += jnp.sum(per_point * mm, axis=0, keepdims=True)
        den_acc_ref[...] += jnp.sum(mm, axis=0, keepdims=True)

    if needs_mask:
        # Edge blocks only: the last (partial) data block and any clamped /
        # duplicated block past the end.  Zero invalid rows BEFORE sqrt /
        # accumulate so stale-VMEM inf/nan cannot leak in.  Interior blocks
        # skip all of this (pl.when gate).
        blk = pl.program_id(0) * pl.num_programs(1) + i         # unclamped intent
        is_edge = (blk + 1) * rows > valid_rows

        @pl.when(jnp.logical_not(is_edge))
        def _():
            _accumulate(sq_sum, m)

        @pl.when(is_edge)
        def _():
            row_ids = blk * rows + jax.lax.broadcasted_iota(
                jnp.int32, (rows, 128), 0)
            valid = row_ids < valid_rows
            _accumulate(jnp.where(valid, sq_sum, 0.0),
                        jnp.where(valid, m, 0.0))
    else:
        _accumulate(sq_sum, m)

    @pl.when(i == pl.num_programs(1) - 1)
    def _finalize():
        num_out_ref[...] = jnp.sum(num_acc_ref[...]).reshape(1, 1, 1)
        den_out_ref[...] = jnp.sum(den_acc_ref[...]).reshape(1, 1, 1)


@functools.partial(jax.jit, static_argnames=("rows_per_tile", "num_parts"))
def _masked_rmse_impl(source, target, mask, rows_per_tile, num_parts):
    B, N, C = source.shape
    M = B * N

    s_flat = source.reshape(M, C)          # zero-copy row-major reshapes
    t_flat = target.reshape(M, C)
    m_flat = mask.reshape(M)

    # Ragged tail (<=127 points when M % 128 != 0): tiny pure-JAX partial sum
    # instead of a full-array jnp.pad HBM pass.
    M_main = (M // 128) * 128
    tail = M - M_main
    if tail:
        td = (s_flat[M_main:].astype(jnp.float32)
              - t_flat[M_main:].astype(jnp.float32))
        t_pp = jnp.sqrt(jnp.sum(td * td, axis=-1))
        t_m = m_flat[M_main:].astype(jnp.float32)
        tail_num = jnp.sum(t_pp * t_m)
        tail_den = jnp.sum(t_m)
    else:
        tail_num = jnp.float32(0.0)
        tail_den = jnp.float32(0.0)

    if M_main == 0:                        # fewer than 128 points: pure JAX
        return (tail_num / tail_den).astype(jnp.float32)

    M_rows = M_main // 128
    # Lane-dense views (the slices only materialize when a ragged tail exists).
    s2 = (s_flat if tail == 0 else s_flat[:M_main]).reshape(M_rows, 128 * C)
    t2 = (t_flat if tail == 0 else t_flat[:M_main]).reshape(M_rows, 128 * C)
    # Mask goes through DMA as int8 (1 B/pt).
    # TODO(synk): pass the bool mask straight through (no astype pass) once
    # bool pallas_call operands are confirmed supported on this jax build.
    m2 = (m_flat if tail == 0 else m_flat[:M_main]).astype(jnp.int8) \
        .reshape(M_rows, 128)

    # Tile selection: biggest block that fits the VMEM budget; second-minor
    # block dim must be a multiple of 32 (int8 mask tiling) unless it spans
    # the whole array.
    if M_rows <= rows_per_tile:
        rows = M_rows
    else:
        assert rows_per_tile % 32 == 0, "rows_per_tile must be a multiple of 32"
        rows = rows_per_tile

    total_blocks = pl.cdiv(M_rows, rows)
    parts = max(1, min(num_parts, total_blocks))
    bpp = pl.cdiv(total_blocks, parts)                 # blocks per parallel part
    needs_clamp = bpp * parts != total_blocks          # duplicated trailing blocks
    needs_mask = needs_clamp or (M_rows % rows != 0)
    last_blk = total_blocks - 1

    def data_map(p, i):
        blk = p * bpp + i
        if needs_clamp:
            blk = jnp.minimum(blk, last_blk)           # dup data; masked in-kernel
        return (blk, 0)

    kernel = functools.partial(
        _masked_rmse_kernel,
        rows=rows, valid_rows=M_rows, channels=C, needs_mask=needs_mask)

    # Raise the scoped-VMEM limit only when the double-buffered working set
    # would not comfortably fit v5e's 16 MiB default.
    est = (2 * rows * 128 * C * (source.dtype.itemsize + target.dtype.itemsize)
           + 2 * rows * 128                            # mask double buffer
           + 128 * C * 128 * 4 + (1 << 20))            # selector + headroom
    vmem_limit = None
    if est > 12 * 2 ** 20:
        vmem_limit = int(min(max(est + 4 * 2 ** 20, 32 * 2 ** 20), 56 * 2 ** 20))
    compiler_params = pltpu.CompilerParams(
        dimension_semantics=("parallel", "arbitrary"),
        vmem_limit_bytes=vmem_limit)

    num, den = pl.pallas_call(
        kernel,
        out_shape=(
            jax.ShapeDtypeStruct((parts, 1, 1), jnp.float32),
            jax.ShapeDtypeStruct((parts, 1, 1), jnp.float32),
        ),
        grid_spec=pltpu.PrefetchScalarGridSpec(
            num_scalar_prefetch=0,
            grid=(parts, bpp),
            in_specs=[
                pl.BlockSpec((rows, 128 * C), data_map),      # source
                pl.BlockSpec((rows, 128 * C), data_map),      # target
                pl.BlockSpec((rows, 128), data_map),          # mask (int8)
            ],
            out_specs=(
                pl.BlockSpec((1, 1, 1), lambda p, i: (p, 0, 0)),
                pl.BlockSpec((1, 1, 1), lambda p, i: (p, 0, 0)),
            ),
            scratch_shapes=[
                pltpu.VMEM((128 * C, 128), jnp.float32),      # ones-selector
                pltpu.VMEM((1, 128), jnp.float32),            # num accumulator
                pltpu.VMEM((1, 128), jnp.float32),            # den accumulator
            ],
        ),
        compiler_params=compiler_params,
    )(s2, t2, m2)

    total_num = jnp.sum(num) + tail_num
    total_den = jnp.sum(den) + tail_den
    # All-False mask -> 0/0 -> NaN, matching torch .mean() over an empty selection.
    return (total_num / total_den).astype(jnp.float32)


def _per_generation_defaults():
    """(rows_per_tile, num_parts) tuned per TPU generation (HBM BW vs VMEM)."""
    try:
        kind = jax.devices()[0].device_kind.lower()
    except Exception:
        return 1024, 1
    if "v5" in kind:                   # v5e/v5p: ~0.8 TB/s, 16 MiB default scoped VMEM
        return 1024, 1
    if "v6" in kind:                   # v6e: ~1.4 TB/s, 32 MiB default scoped VMEM
        return 2048, 1
    if "v7" in kind or "7x" in kind:   # v7x: ~3.2 TB/s, 2 TensorCores, 64 MiB VMEM
        return 2048, 2
    return 1024, 1


def masked_rmse_loss(source, target, mask, rows_per_tile=None, num_parts=None):
    """source, target: (B, N, C); mask: (B, N) bool.  Returns scalar f32.

    rows_per_tile is in units of 128-point rows (1024 -> 131072 points/step).
    Defaults are tuned per TPU generation; pass explicit values to override.
    """
    d_rows, d_parts = _per_generation_defaults()
    if rows_per_tile is None:
        rows_per_tile = d_rows
    if num_parts is None:
        num_parts = d_parts
    return _masked_rmse_impl(source, target, mask, rows_per_tile, num_parts)


def _reference(source, target, mask):
    diff = source.astype(jnp.float32) - target.astype(jnp.float32)
    per_point = jnp.sqrt(jnp.sum(diff * diff, axis=-1))   # (B, N)
    m = mask.astype(jnp.float32)
    return jnp.sum(per_point * m) / jnp.sum(m)


if __name__ == "__main__":
    key = jax.random.PRNGKey(0)
    ks = jax.random.split(key, 9)

    # Small, module-consistent shapes: batch of 2 point clouds, 512 pts, xyz.
    B, N, C = 2, 512, 3
    source = jax.random.normal(ks[0], (B, N, C), dtype=jnp.float32)
    target = jax.random.normal(ks[1], (B, N, C), dtype=jnp.float32)
    mask = jax.random.bernoulli(ks[2], p=0.6, shape=(B, N))

    loss = jax.block_until_ready(masked_rmse_loss(source, target, mask))
    ref = _reference(source, target, mask)
    assert jnp.allclose(loss, ref, rtol=1e-5, atol=1e-6), (loss, ref)

    # Non-128-multiple point count with forced small tiles: exercises the
    # ragged pure-JAX tail, multi-block grid, edge masking, and the 2-part
    # clamp/duplicate path.
    B2, N2 = 2, 8300
    src2 = jax.random.normal(ks[3], (B2, N2, C), dtype=jnp.float32)
    tgt2 = jax.random.normal(ks[4], (B2, N2, C), dtype=jnp.float32)
    msk2 = jax.random.bernoulli(ks[5], p=0.5, shape=(B2, N2))
    loss2 = jax.block_until_ready(
        masked_rmse_loss(src2, tgt2, msk2, rows_per_tile=32, num_parts=2))
    ref2 = _reference(src2, tgt2, msk2)
    assert jnp.allclose(loss2, ref2, rtol=1e-4, atol=1e-6), (loss2, ref2)

    # Default (generation-tuned) tile config with multiple blocks, a partial
    # last block, and a ragged tail.
    B3, N3 = 4, 70000
    src3 = jax.random.normal(ks[6], (B3, N3, C), dtype=jnp.float32)
    tgt3 = jax.random.normal(ks[7], (B3, N3, C), dtype=jnp.float32)
    msk3 = jax.random.bernoulli(ks[8], p=0.5, shape=(B3, N3))
    loss3 = jax.block_until_ready(masked_rmse_loss(src3, tgt3, msk3))
    ref3 = _reference(src3, tgt3, msk3)
    assert jnp.allclose(loss3, ref3, rtol=5e-4, atol=1e-5), (loss3, ref3)

    print("KERNEL_OK")
</pallas_src>

<mosaic_0001>
module attributes {stable_mosaic.version = 11 : i64} {
  func.func @_masked_rmse_kernel(%arg0: i32, %arg1: i32, %arg2: memref<8x384xf32, #tpu.memory_space<vmem>>, %arg3: memref<8x384xf32, #tpu.memory_space<vmem>>, %arg4: memref<8x128xi8, #tpu.memory_space<vmem>>, %arg5: memref<1x1x1xf32, #tpu.memory_space<vmem>>, %arg6: memref<1x1x1xf32, #tpu.memory_space<vmem>>, %arg7: memref<384x128xf32, #tpu.memory_space<vmem>>, %arg8: memref<1x128xf32, #tpu.memory_space<vmem>>, %arg9: memref<1x128xf32, #tpu.memory_space<vmem>>) attributes {dimension_semantics = [#tpu.dimension_semantics<parallel>, #tpu.dimension_semantics<arbitrary>], iteration_bounds = array<i64: 1, 1>, scalar_prefetch = 0 : i64, scratch_operands = 3 : i64, tpu.core_type = #tpu.core_type<tc>, window_params = [{transform_indices = @transform_0, window_bounds = array<i64: 8, 384>}, {transform_indices = @transform_1, window_bounds = array<i64: 8, 384>}, {transform_indices = @transform_2, window_bounds = array<i64: 8, 128>}, {transform_indices = @transform_3, window_bounds = array<i64: 1, 1, 1>}, {transform_indices = @transform_4, window_bounds = array<i64: 1, 1, 1>}]} {
    %c0_i32 = arith.constant 0 : i32
    %0 = arith.cmpi eq, %arg1, %c0_i32 : i32
    %1 = arith.extui %0 : i1 to i32
    %c0_i32_0 = arith.constant 0 : i32
    %2 = arith.cmpi ne, %1, %c0_i32_0 : i32
    scf.if %2 {
      %26 = tpu.iota {dimensions = array<i32: 0>} : vector<384x128xi32>
      %27 = tpu.iota {dimensions = array<i32: 1>} : vector<384x128xi32>
      %c3_i32 = arith.constant 3 : i32
      %28 = vector.broadcast %c3_i32 : i32 to vector<384x128xi32>
      %29 = arith.muli %27, %28 : vector<384x128xi32>
      %30 = arith.cmpi sge, %26, %29 : vector<384x128xi32>
      %c3_i32_20 = arith.constant 3 : i32
      %31 = vector.broadcast %c3_i32_20 : i32 to vector<384x128xi32>
      %32 = arith.addi %29, %31 : vector<384x128xi32>
      %33 = arith.cmpi slt, %26, %32 : vector<384x128xi32>
      %34 = arith.andi %30, %33 : vector<384x128xi1>
      %35 = arith.extui %34 : vector<384x128xi1> to vector<384x128xi32>
      %36 = arith.sitofp %35 : vector<384x128xi32> to vector<384x128xf32>
      %c0_21 = arith.constant 0 : index
      %c0_22 = arith.constant 0 : index
      %37 = vector.load %arg7[%c0_21, %c0_22] : memref<384x128xf32, #tpu.memory_space<vmem>>, vector<384x128xf32>
      tpu.vector_store %arg7[%c0_21, %c0_22], %36 {strides = array<i32>} : memref<384x128xf32, #tpu.memory_space<vmem>>, vector<384x128xf32>,
      %cst_23 = arith.constant 0.000000e+00 : f32
      %38 = vector.broadcast %cst_23 : f32 to vector<1x128xf32>
      %c0_24 = arith.constant 0 : index
      %c0_25 = arith.constant 0 : index
      %39 = vector.load %arg8[%c0_24, %c0_25] : memref<1x128xf32, #tpu.memory_space<vmem>>, vector<1x128xf32>
      tpu.vector_store %arg8[%c0_24, %c0_25], %38 {strides = array<i32>} : memref<1x128xf32, #tpu.memory_space<vmem>>, vector<1x128xf32>,
      %cst_26 = arith.constant 0.000000e+00 : f32
      %40 = vector.broadcast %cst_26 : f32 to vector<1x128xf32>
      %c0_27 = arith.constant 0 : index
      %c0_28 = arith.constant 0 : index
      %41 = vector.load %arg9[%c0_27, %c0_28] : memref<1x128xf32, #tpu.memory_space<vmem>>, vector<1x128xf32>
      tpu.vector_store %arg9[%c0_27, %c0_28], %40 {strides = array<i32>} : memref<1x128xf32, #tpu.memory_space<vmem>>, vector<1x128xf32>,
    } else {
    }
    %c0 = arith.constant 0 : index
    %c0_1 = arith.constant 0 : index
    %3 = vector.load %arg2[%c0, %c0_1] : memref<8x384xf32, #tpu.memory_space<vmem>>, vector<8x384xf32>
    %c0_2 = arith.constant 0 : index
    %c0_3 = arith.constant 0 : index
    %4 = vector.load %arg3[%c0_2, %c0_3] : memref<8x384xf32, #tpu.memory_space<vmem>>, vector<8x384xf32>
    %5 = arith.subf %3, %4 : vector<8x384xf32>
    %6 = arith.mulf %5, %5 : vector<8x384xf32>
    %c0_4 = arith.constant 0 : index
    %c0_5 = arith.constant 0 : index
    %7 = vector.load %arg7[%c0_4, %c0_5] : memref<384x128xf32, #tpu.memory_space<vmem>>, vector<384x128xf32>
    %cst = arith.constant dense<0.000000e+00> : vector<8x128xf32>
    %8 = tpu.matmul %6, %7, %cst {dimension_numbers = #tpu.dot_dimension_numbers<[1], [0], [0], [1], [0, 0, 1, 1], [], []>} : vector<8x384xf32>, vector<384x128xf32>, vector<8x128xf32> -> vector<8x128xf32>
    %c0_6 = arith.constant 0 : index
    %c0_7 = arith.constant 0 : index
    %9 = vector.load %arg4[%c0_6, %c0_7] : memref<8x128xi8, #tpu.memory_space<vmem>>, vector<8x128xi8>
    %10 = arith.sitofp %9 : vector<8x128xi8> to vector<8x128xf32>
    %11 = math.sqrt %8 : vector<8x128xf32>
    %c0_8 = arith.constant 0 : index
    %c0_9 = arith.constant 0 : index
    %12 = vector.load %arg8[%c0_8, %c0_9] : memref<1x128xf32, #tpu.memory_space<vmem>>, vector<1x128xf32>
    %13 = arith.mulf %11, %10 : vector<8x128xf32>
    %cst_10 = arith.constant dense<0.000000e+00> : vector<128xf32>
    %14 = vector.multi_reduction <add>, %13, %cst_10 [0] : vector<8x128xf32> to vector<128xf32>
    %15 = vector.shape_cast %14 : vector<128xf32> to vector<1x128xf32>
    %16 = arith.addf %12, %15 : vector<1x128xf32>
    %c0_11 = arith.constant 0 : index
    %c0_12 = arith.constant 0 : index
    %17 = vector.load %arg8[%c0_11, %c0_12] : memref<1x128xf32, #tpu.memory_space<vmem>>, vector<1x128xf32>
    tpu.vector_store %arg8[%c0_11, %c0_12], %16 {strides = array<i32>} : memref<1x128xf32, #tpu.memory_space<vmem>>, vector<1x128xf32>,
    %c0_13 = arith.constant 0 : index
    %c0_14 = arith.constant 0 : index
    %18 = vector.load %arg9[%c0_13, %c0_14] : memref<1x128xf32, #tpu.memory_space<vmem>>, vector<1x128xf32>
    %cst_15 = arith.constant dense<0.000000e+00> : vector<128xf32>
    %19 = vector.multi_reduction <add>, %10, %cst_15 [0] : vector<8x128xf32> to vector<128xf32>
    %20 = vector.shape_cast %19 : vector<128xf32> to vector<1x128xf32>
    %21 = arith.addf %18, %20 : vector<1x128xf32>
    %c0_16 = arith.constant 0 : index
    %c0_17 = arith.constant 0 : index
    %22 = vector.load %arg9[%c0_16, %c0_17] : memref<1x128xf32, #tpu.memory_space<vmem>>, vector<1x128xf32>
    tpu.vector_store %arg9[%c0_16, %c0_17], %21 {strides = array<i32>} : memref<1x128xf32, #tpu.memory_space<vmem>>, vector<1x128xf32>,
    %c0_i32_18 = arith.constant 0 : i32
    %23 = arith.cmpi eq, %arg1, %c0_i32_18 : i32
    %24 = arith.extui %23 : i1 to i32
    %c0_i32_19 = arith.constant 0 : i32
    %25 = arith.cmpi ne, %24, %c0_i32_19 : i32
    scf.if %25 {
      %c0_20 = arith.constant 0 : index
      %c0_21 = arith.constant 0 : index
      %26 = vector.load %arg8[%c0_20, %c0_21] : memref<1x128xf32, #tpu.memory_space<vmem>>, vector<1x128xf32>
      %27 = vector.shape_cast %26 : vector<1x128xf32> to vector<1x1x128xf32>
      %cst_22 = arith.constant dense<0.000000e+00> : vector<1xf32>
      %28 = vector.multi_reduction <add>, %27, %cst_22 [1, 2] : vector<1x1x128xf32> to vector<1xf32>
      %29 = vector.shape_cast %28 : vector<1xf32> to vector<1x1x1xf32>
      %30 = vector.extract %29[0, 0, 0] : f32 from vector<1x1x1xf32>
      %31 = vector.broadcast %30 : f32 to vector<1x1x1xf32>
      %c0_23 = arith.constant 0 : index
      %c0_24 = arith.constant 0 : index
      %c0_25 = arith.constant 0 : index
      %32 = vector.load %arg5[%c0_23, %c0_24, %c0_25] : memref<1x1x1xf32, #tpu.memory_space<vmem>>, vector<1x1x1xf32>
      tpu.vector_store %arg5[%c0_23, %c0_24, %c0_25], %31 {strides = array<i32>} : memref<1x1x1xf32, #tpu.memory_space<vmem>>, vector<1x1x1xf32>,
      %c0_26 = arith.constant 0 : index
      %c0_27 = arith.constant 0 : index
      %33 = vector.load %arg9[%c0_26, %c0_27] : memref<1x128xf32, #tpu.memory_space<vmem>>, vector<1x128xf32>
      %34 = vector.shape_cast %33 : vector<1x128xf32> to vector<1x1x128xf32>
      %cst_28 = arith.constant dense<0.000000e+00> : vector<1xf32>
      %35 = vector.multi_reduction <add>, %34, %cst_28 [1, 2] : vector<1x1x128xf32> to vector<1xf32>
      %36 = vector.shape_cast %35 : vector<1xf32> to vector<1x1x1xf32>
      %37 = vector.extract %36[0, 0, 0] : f32 from vector<1x1x1xf32>
      %38 = vector.broadcast %37 : f32 to vector<1x1x1xf32>
      %c0_29 = arith.constant 0 : index
      %c0_30 = arith.constant 0 : index
      %c0_31 = arith.constant 0 : index
      %39 = vector.load %arg6[%c0_29, %c0_30, %c0_31] : memref<1x1x1xf32, #tpu.memory_space<vmem>>, vector<1x1x1xf32>
      tpu.vector_store %arg6[%c0_29, %c0_30, %c0_31], %38 {strides = array<i32>} : memref<1x1x1xf32, #tpu.memory_space<vmem>>, vector<1x1x1xf32>,
    } else {
    }
    return
  }
  func.func @transform_0(%arg0: i32, %arg1: i32) -> (i32, i32) {
    %c1_i32 = arith.constant 1 : i32
    %0 = arith.muli %arg0, %c1_i32 : i32
    %1 = arith.addi %0, %arg1 : i32
    %c0_i32 = arith.constant 0 : i32
    %c0_i32_0 = arith.constant 0 : i32
    return %1, %c0_i32 : i32, i32
  }
  func.func @transform_1(%arg0: i32, %arg1: i32) -> (i32, i32) {
    %c1_i32 = arith.constant 1 : i32
    %0 = arith.muli %arg0, %c1_i32 : i32
    %1 = arith.addi %0, %arg1 : i32
    %c0_i32 = arith.constant 0 : i32
    %c0_i32_0 = arith.constant 0 : i32
    return %1, %c0_i32 : i32, i32
  }
  func.func @transform_2(%arg0: i32, %arg1: i32) -> (i32, i32) {
    %c1_i32 = arith.constant 1 : i32
    %0 = arith.muli %arg0, %c1_i32 : i32
    %1 = arith.addi %0, %arg1 : i32
    %c0_i32 = arith.constant 0 : i32
    %c0_i32_0 = arith.constant 0 : i32
    return %1, %c0_i32 : i32, i32
  }
  func.func @transform_3(%arg0: i32, %arg1: i32) -> (i32, i32, i32) {
    %c0_i32 = arith.constant 0 : i32
    %c0_i32_0 = arith.constant 0 : i32
    %c0_i32_1 = arith.constant 0 : i32
    return %arg0, %c0_i32, %c0_i32_0 : i32, i32, i32
  }
  func.func @transform_4(%arg0: i32, %arg1: i32) -> (i32, i32, i32) {
    %c0_i32 = arith.constant 0 : i32
    %c0_i32_0 = arith.constant 0 : i32
    %c0_i32_1 = arith.constant 0 : i32
    return %arg0, %c0_i32, %c0_i32_0 : i32, i32, i32
  }
}

</mosaic_0001>

<bundles_post_ra>
// kernel: _masked_rmse_impl.1
= control target key start
LH: loop header
LB: loop body
LE: loop exit
PB: predicated region body
PF: predicated region fallthrough
CT: control target
= control target key end

     0   :  { %10 = vsyncpa [#allocation6], 0  ;;  %v79_v0 = vlaneseq  ;;  %v1027_v3 = vmov 0.0|0.0   ;;  %v1028_v7 = vmov 0.0   ;;  %vm1029_vm0 = vmmov 0   ;;  %s1388_s0 = inlined_call_operand.vmem [shape: f32[8,384], index: 0, kind: input, shape index: {}]   ;;  %s1389_s1 = inlined_call_operand.vmem [shape: f32[8,384], index: 1, kind: input, shape index: {}]   ;;  %s1390_s2 = inlined_call_operand.vmem [shape: s8[8,128], index: 2, kind: input, shape index: {}]   ;;  %s1391_s3 = inlined_call_operand.hbm [shape: f32[1,1,1], index: 3, kind: output, shape index: {0}]   ;;  %s1392_s4 = inlined_call_operand.hbm [shape: f32[1,1,1], index: 4, kind: output, shape index: {1}]  }
   0x1   :  { %v423_v1 = vld [vmem:[%s1388_s0 + $0x8] sm:$0xff]  ;;  %943 = vmatprep.subr.bf16.mxu1 %v1027_v3  ;;  %420 = vst [vmem:[#allocation3] sm:$0x1] %v1028_v7  ;;  %421 = vst [vmem:[#allocation4] sm:$0x1] %v1028_v7  ;;  %908 = vmatprep.mubr.msk.f32.mxu1 %vm1029_vm0, %v1028_v7 }
   0x2   :  { %v426_v2 = vld [vmem:[%s1389_s1 + $0x8] sm:$0xff]  ;;  %v1065_v5 = vshrl.u32 %v79_v0, 7  ;;  %v129_v6 = vand.u32 127, %v79_v0 }
   0x3   :  { %v429_v4 = vsub.f32 %v423_v1, %v426_v2 }
   0x4   :  { %11 = vsyncpa [#allocation8], 0  ;;  %v96_v9 = vadd.s32 128, %v1065_v5  ;;  %v97_v10 = vadd.s32 136, %v1065_v5  ;;  %v1069_v11 = vmul.u32 3, %v129_v6  ;;  %v81_v13 = vadd.s32 8, %v1065_v5 }
   0x5   :  { %v432_v8 = vmul.f32 %v429_v4, %v429_v4  ;;  %v112_v14 = vadd.s32 256, %v1065_v5  ;;  %v113_v15 = vadd.s32 264, %v1065_v5  ;;  %v98_v16 = vadd.s32 144, %v1065_v5  ;;  %v622_v32 = vld [vmem:[%s1390_s2] sm:$0x3]  ;;  %s1032_s29 = smov [#allocation7]  }
   0x6   :  { %vm147_vm1 = vcmp.ge.s32.totalorder %v96_v9, %v1069_v11  ;;  %v1073_v12 = vadd.s32 3, %v1069_v11  ;;  %vm148_vm2 = vcmp.ge.s32.totalorder %v97_v10, %v1069_v11  ;;  %vm131_vm6 = vcmp.ge.s32.totalorder %v1065_v5, %v1069_v11  ;;  %s698_s30 = sshll.u32 %s1032_s29, 4  ;;  %s699_s30 = int_to_ptr.vmem [resolvable:$true] %s698_s30 }
   0x7   :  { %546 = vmatprep.mubr.f32.mxu0 %v432_v8  ;;  %vm132_vm9 = vcmp.ge.s32.totalorder %v81_v13, %v1069_v11  ;;  %v1030_v17 = vmov 1.0|1.0   ;;  %vm163_vm13 = vcmp.ge.s32.totalorder %v112_v14, %v1069_v11  ;;  %v99_v18 = vadd.s32 152, %v1065_v5 }
   0x8   :  { %vm196_vm3 = vcmp.lt.s32.totalorder %v96_v9, %v1073_v12  ;;  %vm197_vm4 = vcmp.lt.s32.totalorder %v97_v10, %v1073_v12  ;;  %vm180_vm7 = vcmp.lt.s32.totalorder %v1065_v5, %v1073_v12  ;;  %vm181_vm10 = vcmp.lt.s32.totalorder %v81_v13, %v1073_v12  ;;  %v642_v60 = vld [vmem:[#allocation4] sm:$0x1] }
   0x9   :  { %vm244_vm5 = vmand %vm147_vm1, %vm196_vm3  ;;  %vm212_vm14 = vcmp.lt.s32.totalorder %v112_v14, %v1073_v12  ;;  %vm164_vm0 = vcmp.ge.s32.totalorder %v113_v15, %v1069_v11  ;;  %vm213_vm1 = vcmp.lt.s32.totalorder %v113_v15, %v1073_v12  ;;  %v82_v19 = vadd.s32 16, %v1065_v5  ;;  %v425_v10 = vld [vmem:[%s1389_s1] sm:$0xff]  ;;  %v424_v14 = vld [vmem:[%s1388_s0 + $0x10] sm:$0xff] }
   0xa   :  { %vm245_vm8 = vmand %vm148_vm2, %vm197_vm4  ;;  %vm149_vm4 = vcmp.ge.s32.totalorder %v98_v16, %v1069_v11  ;;  %v83_v20 = vadd.s32 24, %v1065_v5  ;;  %v114_v21 = vadd.s32 272, %v1065_v5  ;;  %v115_v22 = vadd.s32 280, %v1065_v5  ;;  %v427_v15 = vld [vmem:[%s1389_s1 + $0x10] sm:$0xff] }
   0xb   :  { %vm911_vm11 = vmpackc.low %vm245_vm8, %vm244_vm5  ;;  %vm198_vm5 = vcmp.lt.s32.totalorder %v98_v16, %v1073_v12  ;;  %vm199_vm8 = vcmp.lt.s32.totalorder %v99_v18, %v1073_v12  ;;  %v100_v23 = vadd.s32 160, %v1065_v5  ;;  %v101_v24 = vadd.s32 168, %v1065_v5 }
   0xc   :  { %912 = vmatprep.subr.msk.bf16.mxu0 %vm911_vm11, %v1030_v17  ;;  %vm228_vm12 = vmand %vm131_vm6, %vm180_vm7  ;;  %vm150_vm7 = vcmp.ge.s32.totalorder %v99_v18, %v1069_v11  ;;  %vm133_vm11 = vcmp.ge.s32.totalorder %v82_v19, %v1069_v11  ;;  %v84_v25 = vadd.s32 32, %v1065_v5  ;;  %v85_v26 = vadd.s32 40, %v1065_v5 }
   0xd   :  { %vm229_vm15 = vmand %vm132_vm9, %vm181_vm10  ;;  %v116_v27 = vadd.s32 288, %v1065_v5  ;;  %v117_v28 = vadd.s32 296, %v1065_v5  ;;  %v102_v29 = vadd.s32 176, %v1065_v5  ;;  %v103_v30 = vadd.s32 184, %v1065_v5 }
   0xe   :  { %vm913_vm2 = vmpackc.low %vm229_vm15, %vm228_vm12  ;;  %vm182_vm12 = vcmp.lt.s32.totalorder %v82_v19, %v1073_v12  ;;  %vm183_vm15 = vcmp.lt.s32.totalorder %v83_v20, %v1073_v12  ;;  %v86_v31 = vadd.s32 48, %v1065_v5  ;;  %v87_v33 = vadd.s32 56, %v1065_v5 }
   0xf   :  { %914 = vmatpush3.bf16.msk.msra.mxu0 %vm913_vm2, %v1030_v17  ;;  %vm260_vm3 = vmand %vm163_vm13, %vm212_vm14  ;;  %vm134_vm14 = vcmp.ge.s32.totalorder %v83_v20, %v1069_v11  ;;  %vm165_vm2 = vcmp.ge.s32.totalorder %v114_v21, %v1069_v11  ;;  %v118_v34 = vadd.s32 304, %v1065_v5  ;;  %v119_v35 = vadd.s32 312, %v1065_v5 }
  0x10   :  { %vm261_vm6 = vmand %vm164_vm0, %vm213_vm1  ;;  %v623_v36 = vunpack.c.0.s8 %v622_v32  ;;  %v1157_v38 = vadd.s32 240, %v1065_v5  ;;  %v1160_v39 = vadd.s32 248, %v1065_v5  ;;  %v1163_v40 = vadd.s32 112, %v1065_v5 }
  0x11   :  { %vm944_vm9 = vmpackc.low %vm261_vm6, %vm260_vm3  ;;  %vm214_vm3 = vcmp.lt.s32.totalorder %v114_v21, %v1073_v12  ;;  %vm215_vm6 = vcmp.lt.s32.totalorder %v115_v22, %v1073_v12  ;;  %v104_v41 = vadd.s32 192, %v1065_v5  ;;  %v105_v42 = vadd.s32 200, %v1065_v5 }
  0x12   :  { %945 = vmatpush3.bf16.msk.msra.mxu1 %vm944_vm9, %v1030_v17  ;;  %vm246_vm10 = vmand %vm149_vm4, %vm198_vm5  ;;  %vm166_vm5 = vcmp.ge.s32.totalorder %v115_v22, %v1069_v11  ;;  %vm151_vm9 = vcmp.ge.s32.totalorder %v100_v23, %v1069_v11  ;;  %v1194_v44 = vadd.s32 120, %v1065_v5  ;;  %v1204_v45 = vadd.s32 368, %v1065_v5 }
  0x13   :  { %vm247_vm13 = vmand %vm150_vm7, %vm199_vm8  ;;  %946 = vmatprep.subr.bf16.mxu1 %v1027_v3  ;;  %v1207_v46 = vadd.s32 376, %v1065_v5  ;;  %v1219_v47 = vcvt.s32.f32 %v623_v36  ;;  %v88_v48 = vadd.s32 64, %v1065_v5  ;;  %v89_v50 = vadd.s32 72, %v1065_v5 }
  0x14   :  { %vm915_vm0 = vmpackc.low %vm247_vm13, %vm246_vm10  ;;  %vm200_vm10 = vcmp.lt.s32.totalorder %v100_v23, %v1073_v12  ;;  %vm201_vm13 = vcmp.lt.s32.totalorder %v101_v24, %v1073_v12  ;;  %v120_v52 = vadd.s32 320, %v1065_v5  ;;  %v121_v53 = vadd.s32 328, %v1065_v5 }
  0x15   :  { %916 = vmatprep.subr.msk.bf16.mxu0 %vm915_vm0, %v1030_v17  ;;  %vm230_vm1 = vmand %vm133_vm11, %vm182_vm12  ;;  %vm152_vm12 = vcmp.ge.s32.totalorder %v101_v24, %v1069_v11  ;;  %vm135_vm0 = vcmp.ge.s32.totalorder %v84_v25, %v1069_v11  ;;  %v643_v49 = vrot.slane %v1219_v47, 4  ;;  %v106_v55 = vadd.s32 208, %v1065_v5 }
  0x16   :  { %vm231_vm4 = vmand %vm134_vm14, %vm183_vm15  ;;  %v107_v57 = vadd.s32 216, %v1065_v5  ;;  %v90_v59 = vadd.s32 80, %v1065_v5  ;;  %v91_v61 = vadd.s32 88, %v1065_v5  ;;  %v122_v63 = vadd.s32 336, %v1065_v5 }
  0x17   :  { %vm917_vm7 = vmpackc.low %vm231_vm4, %vm230_vm1  ;;  %vm184_vm1 = vcmp.lt.s32.totalorder %v84_v25, %v1073_v12  ;;  %vm185_vm4 = vcmp.lt.s32.totalorder %v85_v26, %v1073_v12  ;;  %v644_v51 = vadd.f32 %v643_v49, %v1219_v47  ;;  %v123_v1 = vadd.s32 344, %v1065_v5 }
  0x18   :  { %918 = vmatpush3.bf16.msk.msra.mxu0 %vm917_vm7, %v1030_v17  ;;  %vm262_vm8 = vmand %vm165_vm2, %vm214_vm3  ;;  %vm136_vm3 = vcmp.ge.s32.totalorder %v85_v26, %v1069_v11  ;;  %vm167_vm7 = vcmp.ge.s32.totalorder %v116_v27, %v1069_v11  ;;  %v108_v2 = vadd.s32 224, %v1065_v5  ;;  %v109_v4 = vadd.s32 232, %v1065_v5 }
  0x19   :  { %vm263_vm11 = vmand %vm166_vm5, %vm215_vm6  ;;  %v645_v54 = vrot.slane %v644_v51, 2  ;;  %v92_v6 = vadd.s32 96, %v1065_v5  ;;  %v93_v7 = vadd.s32 104, %v1065_v5  ;;  %v124_v8 = vadd.s32 352, %v1065_v5 }
  0x1a   :  { %vm947_vm14 = vmpackc.low %vm263_vm11, %vm262_vm8  ;;  %vm216_vm8 = vcmp.lt.s32.totalorder %v116_v27, %v1073_v12  ;;  %vm217_vm11 = vcmp.lt.s32.totalorder %v117_v28, %v1073_v12  ;;  %v125_v9 = vadd.s32 360, %v1065_v5  ;;  %v422_v5 = vld [vmem:[%s1388_s0] sm:$0xff]  ;;  %s1031_s0 = smov [#allocation5]  }
  0x1b   :  { %948 = vmatpush3.bf16.msk.msra.mxu1 %vm947_vm14, %v1030_v17  ;;  %vm248_vm15 = vmand %vm151_vm9, %vm200_vm10  ;;  %vm168_vm10 = vcmp.ge.s32.totalorder %v117_v28, %v1069_v11  ;;  %v646_v56 = vadd.f32 %v645_v54, %v644_v51  ;;  %v428_v13 = vsub.f32 %v422_v5, %v425_v10  ;;  %s688_s1 = sshll.u32 %s1031_s0, 4  ;;  %s689_s1 = int_to_ptr.vmem [resolvable:$true] %s688_s1 }
  0x1c   :  { %vm249_vm2 = vmand %vm152_vm12, %vm201_vm13  ;;  %949 = vmatprep.subr.bf16.mxu1 %v1027_v3  ;;  %vm153_vm13 = vcmp.ge.s32.totalorder %v102_v29, %v1069_v11  ;;  %s979_s5 = scalar_lea.vmem %s689_s1, 16  ;;  %s983_s6 = scalar_lea.vmem %s689_s1, 32 }
  0x1d   :  { %vm919_vm5 = vmpackc.low %vm249_vm2, %vm248_vm15  ;;  %vm154_vm15 = vcmp.ge.s32.totalorder %v103_v30, %v1069_v11  ;;  %vm137_vm2 = vcmp.ge.s32.totalorder %v86_v31, %v1069_v11  ;;  %v647_v58 = vrot.slane %v646_v56, 1  ;;  %v431_v16 = vmul.f32 %v428_v13, %v428_v13  ;;  %p980_p0 = scmp.ne.s32.totalorder %s689_s1, %s979_s5  ;;  %p984_p1 = scmp.lt.s32.totalorder %s689_s1, %s689_s1 }
  0x1e   :  { %920 = vmatprep.subr.msk.bf16.mxu0 %vm919_vm5, %v1030_v17  ;;  %vm232_vm6 = vmand %vm135_vm0, %vm184_vm1  ;;  %vm202_vm0 = vcmp.lt.s32.totalorder %v102_v29, %v1073_v12  ;;  %vm203_vm1 = vcmp.lt.s32.totalorder %v103_v30, %v1073_v12  ;;  %p985_p2 = scmp.lt.s32.totalorder %s983_s6, %s979_s5 }
  0x1f   :  { %vm233_vm9 = vmand %vm136_vm3, %vm185_vm4  ;;  %vm186_vm4 = vcmp.lt.s32.totalorder %v86_v31, %v1073_v12  ;;  %v648_v62 = vadd.f32 %v647_v58, %v646_v56 }
  0x20   :  { %vm921_vm12 = vmpackc.low %vm233_vm9, %vm232_vm6  ;;  %vm138_vm6 = vcmp.ge.s32.totalorder %v87_v33, %v1069_v11  ;;  %vm169_vm9 = vcmp.ge.s32.totalorder %v118_v34, %v1069_v11  ;;  %p986_p3 = por %p985_p2, %p984_p1 }
  0x21   :  { %922 = vmatpush3.bf16.msk.msra.mxu0 %vm921_vm12, %v1030_v17  ;;  %vm1147_vm14 = vmand %vm167_vm7, %vm216_vm8  ;;  %vm187_vm7 = vcmp.lt.s32.totalorder %v87_v33, %v1073_v12  ;;  %vm218_vm12 = vcmp.lt.s32.totalorder %v118_v34, %v1073_v12  ;;  %v649_v0 = vadd.f32 %v648_v62, %v642_v60  ;;  %v632_v33 = vld [vmem:[#allocation3] sm:$0x1] }
  0x22   :  { %vm265_vm3 = vmand %vm168_vm10, %vm217_vm11  ;;  %vm170_vm10 = vcmp.ge.s32.totalorder %v119_v35, %v1069_v11  ;;  %vm225_vm11 = vcmp.lt.s32.totalorder %v125_v9, %v1073_v12  ;;  %p987_p4 = pnand %p986_p3, %p980_p0 }
  0x23   :  { %vm950_vm5 = vmpackc.low %vm265_vm3, %vm1147_vm14  ;;  %650 = vst [vmem:[#allocation4] sm:$0x1] %v649_v0 }
  0x24   :  { %951 = vmatpush3.bf16.msk.msra.mxu1 %vm950_vm5, %v1030_v17  ;;  %vm1174_vm8 = vmand %vm153_vm13, %vm202_vm0 }
  0x25   :  { %vm251_vm14 = vmand %vm154_vm15, %vm203_vm1  ;;  %952 = vmatprep.subr.bf16.mxu1 %v1027_v3  ;;  %vm188_vm15 = vcmp.lt.s32.totalorder %v88_v48, %v1073_v12 }
  0x26   :  { %vm923_vm5 = vmpackc.low %vm251_vm14, %vm1174_vm8  ;;  %vm219_vm8 = vcmp.lt.s32.totalorder %v119_v35, %v1073_v12 }
  0x27   :  { %924 = vmatprep.subr.msk.bf16.mxu0 %vm923_vm5, %v1030_v17  ;;  %vm234_vm1 = vmand %vm137_vm2, %vm186_vm4  ;;  %vm204_vm2 = vcmp.lt.s32.totalorder %v104_v41, %v1073_v12  ;;  %vm189_vm4 = vcmp.lt.s32.totalorder %v89_v50, %v1073_v12 }
  0x28   :  { %vm235_vm5 = vmand %vm138_vm6, %vm187_vm7  ;;  %vm155_vm7 = vcmp.ge.s32.totalorder %v104_v41, %v1069_v11 }
  0x29   :  { %vm925_vm3 = vmpackc.low %vm235_vm5, %vm234_vm1  ;;  %vm156_vm5 = vcmp.ge.s32.totalorder %v105_v42, %v1069_v11 }
  0x2a   :  { %926 = vmatpush3.bf16.msk.msra.mxu0 %vm925_vm3, %v1030_v17  ;;  %vm266_vm6 = vmand %vm169_vm9, %vm218_vm12  ;;  %vm205_vm3 = vcmp.lt.s32.totalorder %v105_v42, %v1073_v12  ;;  %vm139_vm12 = vcmp.ge.s32.totalorder %v88_v48, %v1069_v11  ;;  %v669_v37 = vld [vmem:[#allocation4] sm:$0x1] }
  0x2b   :  { %vm267_vm1 = vmand %vm170_vm10, %vm219_vm8  ;;  %vm140_vm8 = vcmp.ge.s32.totalorder %v89_v50, %v1069_v11 }
  0x2c   :  { %vm953_vm14 = vmpackc.low %vm267_vm1, %vm266_vm6 }
  0x2d   :  { %954 = vmatpush3.bf16.msk.msra.mxu1 %vm953_vm14, %v1030_v17  ;;  %vm252_vm9 = vmand %vm155_vm7, %vm204_vm2  ;;  %vm171_vm2 = vcmp.ge.s32.totalorder %v120_v52, %v1069_v11  ;;  %vm220_vm7 = vcmp.lt.s32.totalorder %v120_v52, %v1073_v12 }
  0x2e   :  { %vm253_vm10 = vmand %vm156_vm5, %vm205_vm3  ;;  %955 = vmatprep.subr.bf16.mxu1 %v1027_v3  ;;  %vm172_vm5 = vcmp.ge.s32.totalorder %v121_v53, %v1069_v11  ;;  %vm221_vm3 = vcmp.lt.s32.totalorder %v121_v53, %v1073_v12 }
  0x2f   :  { %vm927_vm6 = vmpackc.low %vm253_vm10, %vm252_vm9  ;;  %vm158_vm10 = vcmp.ge.s32.totalorder %v107_v57, %v1069_v11 }
  0x30   :  { %928 = vmatprep.subr.msk.bf16.mxu0 %vm927_vm6, %v1030_v17  ;;  %vm236_vm14 = vmand %vm139_vm12, %vm188_vm15  ;;  %vm157_vm15 = vcmp.ge.s32.totalorder %v106_v55, %v1069_v11  ;;  %vm206_vm12 = vcmp.lt.s32.totalorder %v106_v55, %v1073_v12 }
  0x31   :  { %vm237_vm1 = vmand %vm140_vm8, %vm189_vm4  ;;  %vm207_vm8 = vcmp.lt.s32.totalorder %v107_v57, %v1073_v12 }
  0x32   :  { %vm929_vm0 = vmpackc.low %vm237_vm1, %vm236_vm14  ;;  %vm141_vm14 = vcmp.ge.s32.totalorder %v90_v59, %v1069_v11  ;;  %vm142_vm1 = vcmp.ge.s32.totalorder %v91_v61, %v1069_v11 }
  0x33   :  { %930 = vmatpush3.bf16.msk.msra.mxu0 %vm929_vm0, %v1030_v17  ;;  %vm268_vm9 = vmand %vm171_vm2, %vm220_vm7  ;;  %vm190_vm2 = vcmp.lt.s32.totalorder %v90_v59, %v1073_v12 }
  0x34   :  { %vm269_vm4 = vmand %vm172_vm5, %vm221_vm3  ;;  %vm191_vm5 = vcmp.lt.s32.totalorder %v91_v61, %v1073_v12 }
  0x35   :  { %vm956_vm6 = vmpackc.low %vm269_vm4, %vm268_vm9 }
  0x36   :  { %957 = vmatpush3.bf16.msk.msra.mxu1 %vm956_vm6, %v1030_v17  ;;  %vm254_vm0 = vmand %vm157_vm15, %vm206_vm12  ;;  %vm173_vm15 = vcmp.ge.s32.totalorder %v122_v63, %v1069_v11  ;;  %vm222_vm12 = vcmp.lt.s32.totalorder %v122_v63, %v1073_v12 }
  0x37   :  { %vm255_vm7 = vmand %vm158_vm10, %vm207_vm8  ;;  %958 = vmatprep.subr.bf16.mxu1 %v1027_v3  ;;  %vm174_vm10 = vcmp.ge.s32.totalorder %v123_v1, %v1069_v11  ;;  %vm223_vm8 = vcmp.lt.s32.totalorder %v123_v1, %v1073_v12 }
  0x38   :  { %vm931_vm3 = vmpackc.low %vm255_vm7, %vm254_vm0  ;;  %vm159_vm7 = vcmp.ge.s32.totalorder %v108_v2, %v1069_v11 }
  0x39   :  { %932 = vmatprep.subr.msk.bf16.mxu0 %vm931_vm3, %v1030_v17  ;;  %vm238_vm9 = vmand %vm141_vm14, %vm190_vm2  ;;  %vm208_vm14 = vcmp.lt.s32.totalorder %v108_v2, %v1073_v12  ;;  %vm160_vm3 = vcmp.ge.s32.totalorder %v109_v4, %v1069_v11 }
  0x3a   :  { %vm239_vm4 = vmand %vm142_vm1, %vm191_vm5  ;;  %vm209_vm1 = vcmp.lt.s32.totalorder %v109_v4, %v1073_v12 }
  0x3b   :  { %vm933_vm6 = vmpackc.low %vm239_vm4, %vm238_vm9  ;;  %vm143_vm4 = vcmp.ge.s32.totalorder %v92_v6, %v1069_v11 }
  0x3c   :  { %934 = vmatpush3.bf16.msk.msra.mxu0 %vm933_vm6, %v1030_v17  ;;  %vm270_vm0 = vmand %vm173_vm15, %vm222_vm12  ;;  %vm192_vm15 = vcmp.lt.s32.totalorder %v92_v6, %v1073_v12  ;;  %vm144_vm6 = vcmp.ge.s32.totalorder %v93_v7, %v1069_v11 }
  0x3d   :  { %vm271_vm2 = vmand %vm174_vm10, %vm223_vm8  ;;  %vm193_vm10 = vcmp.lt.s32.totalorder %v93_v7, %v1073_v12 }
  0x3e   :  { %vm959_vm5 = vmpackc.low %vm271_vm2, %vm270_vm0  ;;  %vm175_vm2 = vcmp.ge.s32.totalorder %v124_v8, %v1069_v11 }
  0x3f   :  { %960 = vmatpush3.bf16.msk.msra.mxu1 %vm959_vm5, %v1030_v17  ;;  %vm256_vm9 = vmand %vm159_vm7, %vm208_vm14  ;;  %vm224_vm7 = vcmp.lt.s32.totalorder %v124_v8, %v1073_v12  ;;  %vm176_vm5 = vcmp.ge.s32.totalorder %v125_v9, %v1069_v11 }
  0x40   :  { %vm257_vm12 = vmand %vm160_vm3, %vm209_vm1  ;;  %961 = vmatprep.subr.bf16.mxu1 %v1027_v3 }
  0x41   :  { %vm935_vm8 = vmpackc.low %vm257_vm12, %vm256_vm9 }
  0x42   :  { %936 = vmatprep.subr.msk.bf16.mxu0 %vm935_vm8, %v1030_v17  ;;  %vm240_vm0 = vmand %vm143_vm4, %vm192_vm15  ;;  %vm1397_vm4 = vcmp.lt.s32.totalorder %v1157_v38, %v1073_v12  ;;  %vm1398_vm15 = vcmp.ge.s32.totalorder %v1157_v38, %v1069_v11  ;;  %vm1401_vm8 = vcmp.lt.s32.totalorder %v1163_v40, %v1073_v12 }
  0x43   :  { %vm241_vm14 = vmand %vm144_vm6, %vm193_vm10  ;;  %vm1400_vm6 = vcmp.ge.s32.totalorder %v1160_v39, %v1069_v11 }
  0x44   :  { %vm937_vm3 = vmpackc.low %vm241_vm14, %vm240_vm0  ;;  %vm1402_vm0 = vcmp.ge.s32.totalorder %v1163_v40, %v1069_v11  ;;  %vm1404_vm14 = vcmp.ge.s32.totalorder %v1194_v44, %v1069_v11 }
  0x45   :  { %938 = vmatpush3.bf16.msk.msra.mxu0 %vm937_vm3, %v1030_v17  ;;  %vm272_vm1 = vmand %vm175_vm2, %vm224_vm7  ;;  %vm1403_vm7 = vcmp.lt.s32.totalorder %v1194_v44, %v1073_v12 }
  0x46   :  { %vm273_vm13 = vmand %vm176_vm5, %vm225_vm11  ;;  %vm1399_vm11 = vcmp.lt.s32.totalorder %v1160_v39, %v1073_v12 }
  0x47   :  { %vm962_vm9 = vmpackc.low %vm273_vm13, %vm272_vm1  ;;  %vm1405_vm1 = vcmp.lt.s32.totalorder %v1204_v45, %v1073_v12 }
  0x48   :  { %963 = vmatpush3.bf16.msk.msra.mxu1 %vm962_vm9, %v1030_v17  ;;  %vm258_vm12 = vmand %vm1398_vm15, %vm1397_vm4  ;;  %vm1406_vm9 = vcmp.ge.s32.totalorder %v1204_v45, %v1069_v11  ;;  %vm1407_vm15 = vcmp.lt.s32.totalorder %v1207_v46, %v1073_v12 }
  0x49   :  { %vm259_vm10 = vmand %vm1400_vm6, %vm1399_vm11  ;;  %964 = vmatprep.subr.bf16.mxu1 %v1027_v3  ;;  %v430_v3 = vsub.f32 %v424_v14, %v427_v15 }
  0x4a   :  { %vm939_vm13 = vmpackc.low %vm259_vm10, %vm258_vm12  ;;  %vm1408_vm12 = vcmp.ge.s32.totalorder %v1207_v46, %v1069_v11 }
  0x4b   :  { %940 = vmatprep.subr.msk.bf16.mxu0 %vm939_vm13, %v1030_v17  ;;  %vm242_vm2 = vmand %vm1402_vm0, %vm1401_vm8  ;;  %v433_v18 = vmul.f32 %v430_v3, %v430_v3  ;;  %vm655_vm8 = vcmask 1040384   ;;  %vm667_vm0 = vcmask 0  }
  0x4c   :  { %vm243_vm5 = vmand %vm1404_vm14, %vm1403_vm7  ;;  %v670_v39 = vsel %vm655_vm8, %v669_v37, 0.0 }
  0x4d   :  { %vm941_vm3 = vmpackc.low %vm243_vm5, %vm242_vm2 }
  0x4e   :  { %942 = vmatpush3.bf16.msk.msra.mxu0 %vm941_vm3, %v1030_v17  ;;  %vm274_vm4 = vmand %vm1406_vm9, %vm1405_vm1 }
  0x4f   :  { %vm275_vm11 = vmand %vm1408_vm12, %vm1407_vm15 }
  0x50   :  { %vm965_vm6 = vmpackc.low %vm275_vm11, %vm274_vm4 }
  0x51   :  { %966 = vmatpush3.bf16.msk.msra.mxu1 %vm965_vm6, %v1030_v17  ;;  %547 = vmatmul.mubr.f32.vlgmr.msra.gmra.mrb[0].mxu0 %v431_v16 }
  0x54   :  { %909 = vmatmul.mubr.f32.vlgmr.msra.gmra.mrb[0].mxu1 %v433_v18 }
 0x124   :  { %v856_v19 = vpop.f32.mrb[0].mxu0 }
 0x125   :  { %v857_v20 = vpop.f32.mrb[1].mxu0 }
 0x126   :  { %v858_v21 = vadd.f32 %v857_v20, %v856_v19 }
 0x127   :  { %v618_v22 = vpop.f32.mrb[0].mxu1 }
 0x128   :  { %v619_v23 = vadd.f32 %v858_v21, %v618_v22  ;;  %v910_v24 = vpop.f32.mrb[1].mxu1 }
 0x12a   :  { %977 = vrsqrt.f32 %v619_v23  ;;  %vm627_vm10 = vcmp.eq.f32.partialorder %v619_v23, inf  ;;  %v630_v12 = vand.u32 2147483648, %v619_v23  ;;  %vm629_vm13 = vcmp.eq.f32.partialorder %v619_v23, 0.0 }
 0x134   :  { %v978_v25 = vpop.eup %977 }
 0x135   :  { %v626_v26 = vmul.f32 %v978_v25, %v619_v23 }
 0x137   :  { %v628_v27 = vsel %vm627_vm10, %v619_v23, %v626_v26 }
 0x138   :  { %v631_v11 = vsel %vm629_vm13, %v630_v12, %v628_v27 }
 0x139   :  { %v633_v28 = vmul.f32 %v631_v11, %v1219_v47 }
 0x13b   :  { %v634_v29 = vrot.slane %v633_v28, 4 }
 0x13d   :  { %v635_v17 = vadd.f32 %v634_v29, %v633_v28 }
 0x13f   :  { %v636_v30 = vrot.slane %v635_v17, 2 }
 0x141   :  { %v637_v31 = vadd.f32 %v636_v30, %v635_v17 }
 0x143   :  { %v638_v32 = vrot.slane %v637_v31, 1 }
 0x145   :  { %v639_v34 = vadd.f32 %v638_v32, %v637_v31 }
 0x147   :  { %v640_v35 = vadd.f32 %v639_v34, %v632_v33 }
 0x149   :  { %641 = vst [vmem:[#allocation3] sm:$0x1] %v640_v35 }
 0x150   :  { %v654_v36 = vld [vmem:[#allocation3] sm:$0x1] }
 0x151   :  { %v656_v38 = vsel %vm655_vm8, %v654_v36, 0.0 }
 0x152   :  { %657 = vadd.xlane.f32.xlu0 %v656_v38 }
 0x156   :  { %671 = vadd.xlane.f32.xlu0 %v670_v39 }
 0x1df   :  { %v658_v40 = vpop.xlane.xlu0 %657 }
 0x1e0   :  { %v659_v41 = vrot.slane %v658_v40, 4 }
 0x1e2   :  { %v660_v42 = vadd.f32 %v659_v41, %v658_v40 }
 0x1e3   :  { %v672_v43 = vpop.xlane.xlu0 %671 }
 0x1e4   :  { %v661_v44 = vrot.slane %v660_v42, 2  ;;  %v673_v45 = vrot.slane %v672_v43, 4 }
 0x1e6   :  { %v674_v46 = vadd.f32 %v673_v45, %v672_v43  ;;  %v662_v47 = vadd.f32 %v661_v44, %v660_v42 }
 0x1e8   :  { %v675_v48 = vrot.slane %v674_v46, 2  ;;  %v663_v49 = vrot.slane %v662_v47, 1 }
 0x1ea   :  { %v676_v50 = vadd.f32 %v675_v48, %v674_v46  ;;  %v664_v51 = vadd.f32 %v663_v49, %v662_v47 }
 0x1ec   :  { %967 = vpush %v664_v51  ;;  %v677_v52 = vrot.slane %v676_v50, 1 }
 0x1ee   :  { %v678_v53 = vadd.f32 %v677_v52, %v676_v50 }
 0x1f0   :  { %969 = vpush %v678_v53 }
 0x21d   :  { %s968_s28 = spop %967 }
 0x21e   :  { %v666_v54 = vstv %s968_s28 }
 0x21f   :  { %668 = vst.msk [vmem:[#allocation5] sm:$0x1] %vm667_vm0, %v666_v54 }
 0x220   :  { %990 = shalt.err (!%p987_p4)
}
 0x221   :  { %s991_s9 = scalar_lea.hbm %s1391_s3, 16 }
 0x222   :  { %p992_p5 = scmp.ne.s32.totalorder %s1391_s3, %s991_s9  ;;  %p995_p6 = scmp.lt.u32.totalorder %s991_s9, %s1391_s3 }
 0x224   :  { %p997_p7 = pnand %p995_p6, %p992_p5 }
 0x226   :  { %1000 = shalt.err (!%p997_p7)
}
 0x227   :  { %691 = dma.vmem_to_hbm [thread:$0]  %s689_s1, 16, %s1391_s3, [#allocation6]  }
 0x228   :  { %s970_s16 = spop %969  ;;  %s1001_s17 = scalar_lea.vmem %s699_s30, 16 }
 0x229   :  { %v680_v55 = vstv %s970_s16  ;;  %p1002_p8 = scmp.ne.s32.totalorder %s699_s30, %s1001_s17  ;;  %s1005_s18 = scalar_lea.vmem %s699_s30, 32 }
 0x22a   :  { %681 = vst.msk [vmem:[#allocation7] sm:$0x1] %vm667_vm0, %v680_v55  ;;  %p1006_p9 = scmp.lt.s32.totalorder %s699_s30, %s699_s30  ;;  %p1007_p10 = scmp.lt.s32.totalorder %s1005_s18, %s1001_s17 }
 0x22c   :  { %p1008_p11 = por %p1007_p10, %p1006_p9 }
 0x22e   :  { %p1009_p12 = pnand %p1008_p11, %p1002_p8 }
 0x230   :  { %1012 = shalt.err (!%p1009_p12)
}
 0x231   :  { %s1013_s2 = scalar_lea.hbm %s1392_s4, 16 }
 0x232   :  { %p1014_p13 = scmp.ne.s32.totalorder %s1392_s4, %s1013_s2  ;;  %p1017_p0 = scmp.lt.u32.totalorder %s1013_s2, %s1392_s4 }
 0x234   :  { %p1019_p1 = pnand %p1017_p0, %p1014_p13 }
 0x236   :  { %1022 = shalt.err (!%p1019_p1)
}
 0x237   :  { %701 = dma.vmem_to_hbm [thread:$0]  %s699_s30, 16, %s1392_s4, [#allocation8]  }
 0x238   :  { %1023 = dma.done.wait [#allocation6], 16  }
 0x239   :  { %1024 = vsyncadd [#allocation6], 4294967280 }
 0x23a   :  { %1025 = dma.done.wait [#allocation8], 16  }
 0x23b   :  { %1026 = vsyncadd [#allocation8], 4294967280 }
 0x23c   :  { %708 = vsyncpa [#allocation6], 1 }
 0x23d   :  { %709 = vsyncpa [#allocation8], 1 }

</bundles_post_ra>
